<compile_context>
chip_gen: v6e
topology: v6e:2x2x1
jax: 0.10.0
libtpu: 0.0.40
codegen_flags: <defaults>
</compile_context>

<pallas_src>
import functools
import math

import jax
import jax.numpy as jnp
from jax.experimental import pallas as pl
from jax.experimental.pallas import tpu as pltpu

_NEG_HALF_LOG_2PI = -0.5 * math.log(2.0 * math.pi)


def _tile(dim, target, mult):
    """Full extent if dim fits the target (always a legal block), else the
    largest multiple of `mult` <= target; ragged last block is masked in-kernel
    and out-of-bounds output lanes are dropped by Pallas."""
    if dim <= target:
        return dim
    return max(mult, (target // mult) * mult)


# ---------------------------------------------------------------------------
# Kernel 1: fused weight sampling + transpose to (K, N) + per-tile KL partial
# ---------------------------------------------------------------------------
def _sample_kl_kernel(mu_ref, logvar_ref, eps_ref, wt_ref, kl_ref, *,
                      log_pi1, log_pi2, inv_s1, inv_s2, log_s1, log_s2,
                      n_out, n_in, masked):
    mu = mu_ref[...].astype(jnp.float32)          # (tr, tc)
    logvar = logvar_ref[...].astype(jnp.float32)
    eps = eps_ref[...].astype(jnp.float32)

    sigma = jnp.exp(0.5 * logvar)
    w = mu + sigma * eps                          # f32 sample (KL uses this)
    # Transpose once here (hidden under the HBM-bound DMA) and store bf16 so
    # the matmul kernel gets a (K, N) rhs at native MXU rate.
    wt_ref[...] = w.T.astype(wt_ref.dtype)

    # log q(w | mu, sigma); (w - mu)/sigma == eps exactly by construction.
    log_q = _NEG_HALF_LOG_2PI - 0.5 * logvar - 0.5 * (eps * eps)

    # log p(w): scale-mixture prior, evaluated in log space (robust to
    # underflow of either component).
    lp1 = log_pi1 + _NEG_HALF_LOG_2PI - log_s1 - 0.5 * (w * inv_s1) ** 2
    lp2 = log_pi2 + _NEG_HALF_LOG_2PI - log_s2 - 0.5 * (w * inv_s2) ** 2
    m = jnp.maximum(lp1, lp2)
    log_p = m + jnp.log(jnp.exp(lp1 - m) + jnp.exp(lp2 - m))

    kl_elem = log_q - log_p
    if masked:  # ragged edge tiles: drop out-of-bounds lanes from the KL sum
        tr, tc = mu.shape
        rows = pl.program_id(0) * tr + jax.lax.broadcasted_iota(
            jnp.int32, (tr, tc), 0)
        cols = pl.program_id(1) * tc + jax.lax.broadcasted_iota(
            jnp.int32, (tr, tc), 1)
        kl_elem = jnp.where((rows < n_out) & (cols < n_in), kl_elem, 0.0)

    # One partial KL per grid tile (lane-dense slab so both grid axes can be
    # "parallel"); the host sums [:, :, 0, 0].
    kl_ref[...] = jnp.full(kl_ref.shape, jnp.sum(kl_elem), jnp.float32)


def _sample_and_kl(w_mu, w_logvar, eps_w, pi, sigma1, sigma2):
    n_out, n_in = w_mu.shape
    # tr becomes the lane dim of the transposed output -> multiple of 128 (or
    # full extent); tc likewise.  256x512 f32 tiles => ~3.5 MiB double-buffered.
    tr = _tile(n_out, 256, 128)
    tc = _tile(n_in, 512, 128)
    gr, gc = pl.cdiv(n_out, tr), pl.cdiv(n_in, tc)
    masked = (n_out % tr != 0) or (n_in % tc != 0)

    kernel = functools.partial(
        _sample_kl_kernel,
        log_pi1=(math.log(pi) if pi > 0.0 else -math.inf),
        log_pi2=(math.log1p(-pi) if pi < 1.0 else -math.inf),
        inv_s1=1.0 / sigma1, inv_s2=1.0 / sigma2,
        log_s1=math.log(sigma1), log_s2=math.log(sigma2),
        n_out=n_out, n_in=n_in, masked=masked)

    param_spec = pl.BlockSpec((tr, tc), lambda i, j: (i, j))
    w_t, kl_part = pl.pallas_call(
        kernel,
        out_shape=(jax.ShapeDtypeStruct((n_in, n_out), jnp.bfloat16),
                   jax.ShapeDtypeStruct((gr, gc, 8, 128), jnp.float32)),
        grid_spec=pltpu.PrefetchScalarGridSpec(
            num_scalar_prefetch=0,
            grid=(gr, gc),
            in_specs=[param_spec, param_spec, param_spec],
            out_specs=(pl.BlockSpec((tc, tr), lambda i, j: (j, i)),
                       pl.BlockSpec((1, 1, 8, 128), lambda i, j: (i, j, 0, 0))),
        ),
        compiler_params=pltpu.CompilerParams(
            dimension_semantics=("parallel", "parallel")),
    )(w_mu, w_logvar, eps_w)
    return w_t, kl_part


# ---------------------------------------------------------------------------
# Kernel 2: out = x @ W_sample.T + b_sample
#   rhs arrives pre-transposed as (K, N) bf16; x is cast to bf16 at the MXU;
#   f32 VMEM accumulator; bias *sampling* fused into the last-K epilogue.
# ---------------------------------------------------------------------------
def _linear_kernel(x_ref, wt_ref, bmu_ref, blogvar_ref, beps_ref, o_ref,
                   acc_ref, *, k_dim, mask_k):
    k = pl.program_id(2)

    @pl.when(k == 0)
    def _():
        acc_ref[...] = jnp.zeros_like(acc_ref)

    x = x_ref[...]                      # (tm, tk)
    w = wt_ref[...]                     # (tk, tn) bf16
    if mask_k:                          # ragged last K block: zero the padding
        tk = x.shape[1]
        col = k * tk + jax.lax.broadcasted_iota(jnp.int32, x.shape, 1)
        row = k * tk + jax.lax.broadcasted_iota(jnp.int32, w.shape, 0)
        x = jnp.where(col < k_dim, x, jnp.zeros_like(x))
        w = jnp.where(row < k_dim, w, jnp.zeros_like(w))

    acc_ref[...] += jnp.dot(x.astype(jnp.bfloat16), w,
                            preferred_element_type=jnp.float32)

    @pl.when(k == pl.num_programs(2) - 1)
    def _():
        b = (bmu_ref[...].astype(jnp.float32)
             + jnp.exp(0.5 * blogvar_ref[...].astype(jnp.float32))
             * beps_ref[...].astype(jnp.float32))        # (1, tn) bias sample
        o_ref[...] = (acc_ref[...] + b).astype(o_ref.dtype)


def _linear(x, w_t, b_mu, b_logvar, eps_b):
    M, K = x.shape
    K2, N = w_t.shape
    assert K == K2
    tm = _tile(M, 512, 8)
    tn = _tile(N, 256, 128)
    tk = _tile(K, 1024, 128)
    grid = (pl.cdiv(M, tm), pl.cdiv(N, tn), pl.cdiv(K, tk))
    mask_k = (K % tk) != 0

    kernel = functools.partial(_linear_kernel, k_dim=K, mask_k=mask_k)
    bias_spec = pl.BlockSpec((1, tn), lambda i, j, k: (0, j))
    return pl.pallas_call(
        kernel,
        out_shape=jax.ShapeDtypeStruct((M, N), x.dtype),
        grid_spec=pltpu.PrefetchScalarGridSpec(
            num_scalar_prefetch=0,
            grid=grid,
            in_specs=[
                pl.BlockSpec((tm, tk), lambda i, j, k: (i, k)),
                pl.BlockSpec((tk, tn), lambda i, j, k: (k, j)),
                bias_spec, bias_spec, bias_spec,
            ],
            out_specs=pl.BlockSpec((tm, tn), lambda i, j, k: (i, j)),
            scratch_shapes=[pltpu.VMEM((tm, tn), jnp.float32)],
        ),
        compiler_params=pltpu.CompilerParams(
            dimension_semantics=("parallel", "parallel", "arbitrary")),
    )(x, w_t, b_mu.reshape(1, N), b_logvar.reshape(1, N), eps_b.reshape(1, N))


# ---------------------------------------------------------------------------
# Forward: equivalent of BayesianLinear.fcprobforward (sampling / mle path
# selected by the eps arrays; eps=0 gives the mle path exactly).
# ---------------------------------------------------------------------------
@functools.partial(jax.jit, static_argnames=("pi", "sigma1", "sigma2"))
def bayesian_linear_forward(x, kl, w_mu, w_logvar, b_mu, b_logvar,
                            eps_w, eps_b,
                            pi=0.5, sigma1=math.exp(0.0), sigma2=math.exp(-6.0)):
    w_t, kl_part = _sample_and_kl(w_mu, w_logvar, eps_w, pi, sigma1, sigma2)
    out = _linear(x, w_t, b_mu, b_logvar, eps_b)
    # Each grid tile broadcast its partial KL over an (8,128) slab; take one
    # lane per tile and reduce (tiny XLA sum over `grid` scalars).
    kl_w = jnp.sum(kl_part[:, :, 0, 0])
    return out, kl + kl_w


if __name__ == "__main__":
    key = jax.random.PRNGKey(0)
    ks = jax.random.split(key, 7)

    B, n_in, n_out = 8, 32, 64
    pi, sigma1, sigma2 = 0.5, math.exp(0.0), math.exp(-6.0)
    stv = 10.0 / math.sqrt(n_in)

    x = jax.random.normal(ks[0], (B, n_in), dtype=jnp.float32)
    kl0 = jnp.float32(0.0)
    w_mu = jax.random.uniform(ks[1], (n_out, n_in), jnp.float32, -stv, stv)
    w_logvar = jax.random.uniform(ks[2], (n_out, n_in), jnp.float32, -stv, stv) - 4.0
    b_mu = jax.random.uniform(ks[3], (n_out,), jnp.float32, -stv, stv)
    b_logvar = jax.random.uniform(ks[4], (n_out,), jnp.float32, -stv, stv) - 4.0
    eps_w = jax.random.normal(ks[5], (n_out, n_in), dtype=jnp.float32)
    eps_b = jax.random.normal(ks[6], (n_out,), dtype=jnp.float32)

    out, kl_out = bayesian_linear_forward(
        x, kl0, w_mu, w_logvar, b_mu, b_logvar, eps_w, eps_b,
        pi=pi, sigma1=sigma1, sigma2=sigma2)
    jax.block_until_ready(out)
    jax.block_until_ready(kl_out)

    # ---------------- pure-JAX references ----------------
    sigma_w = jnp.exp(0.5 * w_logvar)
    w_s = w_mu + sigma_w * eps_w
    b_s = b_mu + jnp.exp(0.5 * b_logvar) * eps_b
    # Module (all-f32) semantics.
    out_f32 = jnp.dot(x, w_s.T, precision=jax.lax.Precision.HIGHEST) + b_s
    # Kernel numerics (bf16 MXU operands, f32 accumulate).
    out_bf16 = jnp.dot(x.astype(jnp.bfloat16).astype(jnp.float32),
                       w_s.astype(jnp.bfloat16).astype(jnp.float32).T,
                       precision=jax.lax.Precision.HIGHEST) + b_s

    log_q = (_NEG_HALF_LOG_2PI - jnp.log(sigma_w)
             - 0.5 * ((w_s - w_mu) / sigma_w) ** 2)

    def _norm_logpdf(w, s):
        return _NEG_HALF_LOG_2PI - math.log(s) - 0.5 * (w / s) ** 2

    log_p = jnp.logaddexp(math.log(pi) + _norm_logpdf(w_s, sigma1),
                          math.log1p(-pi) + _norm_logpdf(w_s, sigma2))
    kl_ref = kl0 + jnp.sum(log_q - log_p)

    assert jnp.allclose(out, out_bf16, rtol=2e-2, atol=2e-2), \
        "linear output mismatch (kernel numerics)"
    assert jnp.allclose(out, out_f32, rtol=5e-2, atol=1e-1), \
        "linear output mismatch (f32 module semantics)"
    assert jnp.allclose(kl_out, kl_ref, rtol=1e-3, atol=1.0), "KL mismatch"
    print("KERNEL_OK")
</pallas_src>

<mosaic_0001>
module attributes {stable_mosaic.version = 11 : i64} {
  func.func @_linear_kernel(%arg0: i32, %arg1: i32, %arg2: i32, %arg3: memref<8x32xf32, #tpu.memory_space<vmem>>, %arg4: memref<32x64xbf16, #tpu.memory_space<vmem>>, %arg5: memref<1x64xf32, #tpu.memory_space<vmem>>, %arg6: memref<1x64xf32, #tpu.memory_space<vmem>>, %arg7: memref<1x64xf32, #tpu.memory_space<vmem>>, %arg8: memref<8x64xf32, #tpu.memory_space<vmem>>, %arg9: memref<8x64xf32, #tpu.memory_space<vmem>>) attributes {dimension_semantics = [#tpu.dimension_semantics<parallel>, #tpu.dimension_semantics<parallel>, #tpu.dimension_semantics<arbitrary>], iteration_bounds = array<i64: 1, 1, 1>, scalar_prefetch = 0 : i64, scratch_operands = 1 : i64, tpu.core_type = #tpu.core_type<tc>, window_params = [{transform_indices = @transform_0, window_bounds = array<i64: 8, 32>}, {transform_indices = @transform_1, window_bounds = array<i64: 32, 64>}, {transform_indices = @transform_2, window_bounds = array<i64: 1, 64>}, {transform_indices = @transform_3, window_bounds = array<i64: 1, 64>}, {transform_indices = @transform_4, window_bounds = array<i64: 1, 64>}, {transform_indices = @transform_5, window_bounds = array<i64: 8, 64>}]} {
    %c0_i32 = arith.constant 0 : i32
    %0 = arith.cmpi eq, %arg2, %c0_i32 : i32
    %1 = arith.extui %0 : i1 to i32
    %c0_i32_0 = arith.constant 0 : i32
    %2 = arith.cmpi ne, %1, %c0_i32_0 : i32
    scf.if %2 {
      %cst_10 = arith.constant 0.000000e+00 : f32
      %13 = vector.broadcast %cst_10 : f32 to vector<8x64xf32>
      %c0_11 = arith.constant 0 : index
      %c0_12 = arith.constant 0 : index
      %14 = vector.load %arg9[%c0_11, %c0_12] : memref<8x64xf32, #tpu.memory_space<vmem>>, vector<8x64xf32>
      tpu.vector_store %arg9[%c0_11, %c0_12], %13 {strides = array<i32>} : memref<8x64xf32, #tpu.memory_space<vmem>>, vector<8x64xf32>,
    } else {
    }
    %c0 = arith.constant 0 : index
    %c0_1 = arith.constant 0 : index
    %3 = vector.load %arg3[%c0, %c0_1] : memref<8x32xf32, #tpu.memory_space<vmem>>, vector<8x32xf32>
    %c0_2 = arith.constant 0 : index
    %c0_3 = arith.constant 0 : index
    %4 = vector.load %arg4[%c0_2, %c0_3] : memref<32x64xbf16, #tpu.memory_space<vmem>>, vector<32x64xbf16>
    %c0_4 = arith.constant 0 : index
    %c0_5 = arith.constant 0 : index
    %5 = vector.load %arg9[%c0_4, %c0_5] : memref<8x64xf32, #tpu.memory_space<vmem>>, vector<8x64xf32>
    %6 = arith.truncf %3 : vector<8x32xf32> to vector<8x32xbf16>
    %cst = arith.constant dense<0.000000e+00> : vector<8x64xf32>
    %7 = tpu.matmul %6, %4, %cst {dimension_numbers = #tpu.dot_dimension_numbers<[1], [0], [0], [1], [0, 0, 1, 1], [], []>} : vector<8x32xbf16>, vector<32x64xbf16>, vector<8x64xf32> -> vector<8x64xf32>
    %8 = arith.addf %5, %7 : vector<8x64xf32>
    %c0_6 = arith.constant 0 : index
    %c0_7 = arith.constant 0 : index
    %9 = vector.load %arg9[%c0_6, %c0_7] : memref<8x64xf32, #tpu.memory_space<vmem>>, vector<8x64xf32>
    tpu.vector_store %arg9[%c0_6, %c0_7], %8 {strides = array<i32>} : memref<8x64xf32, #tpu.memory_space<vmem>>, vector<8x64xf32>,
    %c0_i32_8 = arith.constant 0 : i32
    %10 = arith.cmpi eq, %arg2, %c0_i32_8 : i32
    %11 = arith.extui %10 : i1 to i32
    %c0_i32_9 = arith.constant 0 : i32
    %12 = arith.cmpi ne, %11, %c0_i32_9 : i32
    scf.if %12 {
      %c0_10 = arith.constant 0 : index
      %c0_11 = arith.constant 0 : index
      %13 = vector.load %arg5[%c0_10, %c0_11] : memref<1x64xf32, #tpu.memory_space<vmem>>, vector<1x64xf32>
      %c0_12 = arith.constant 0 : index
      %c0_13 = arith.constant 0 : index
      %14 = vector.load %arg6[%c0_12, %c0_13] : memref<1x64xf32, #tpu.memory_space<vmem>>, vector<1x64xf32>
      %cst_14 = arith.constant 5.000000e-01 : f32
      %15 = vector.broadcast %cst_14 : f32 to vector<1x64xf32>
      %16 = arith.mulf %15, %14 : vector<1x64xf32>
      %17 = math.exp %16 : vector<1x64xf32>
      %c0_15 = arith.constant 0 : index
      %c0_16 = arith.constant 0 : index
      %18 = vector.load %arg7[%c0_15, %c0_16] : memref<1x64xf32, #tpu.memory_space<vmem>>, vector<1x64xf32>
      %19 = arith.mulf %17, %18 : vector<1x64xf32>
      %20 = arith.addf %13, %19 : vector<1x64xf32>
      %c0_17 = arith.constant 0 : index
      %c0_18 = arith.constant 0 : index
      %21 = vector.load %arg9[%c0_17, %c0_18] : memref<8x64xf32, #tpu.memory_space<vmem>>, vector<8x64xf32>
      %22 = vector.broadcast %20 : vector<1x64xf32> to vector<8x64xf32>
      %23 = arith.addf %21, %22 : vector<8x64xf32>
      %c0_19 = arith.constant 0 : index
      %c0_20 = arith.constant 0 : index
      %24 = vector.load %arg8[%c0_19, %c0_20] : memref<8x64xf32, #tpu.memory_space<vmem>>, vector<8x64xf32>
      tpu.vector_store %arg8[%c0_19, %c0_20], %23 {strides = array<i32>} : memref<8x64xf32, #tpu.memory_space<vmem>>, vector<8x64xf32>,
    } else {
    }
    return
  }
  func.func @transform_0(%arg0: i32, %arg1: i32, %arg2: i32) -> (i32, i32) {
    %c0_i32 = arith.constant 0 : i32
    return %arg0, %arg2 : i32, i32
  }
  func.func @transform_1(%arg0: i32, %arg1: i32, %arg2: i32) -> (i32, i32) {
    %c0_i32 = arith.constant 0 : i32
    return %arg2, %arg1 : i32, i32
  }
  func.func @transform_2(%arg0: i32, %arg1: i32, %arg2: i32) -> (i32, i32) {
    %c0_i32 = arith.constant 0 : i32
    %c0_i32_0 = arith.constant 0 : i32
    return %c0_i32, %arg1 : i32, i32
  }
  func.func @transform_3(%arg0: i32, %arg1: i32, %arg2: i32) -> (i32, i32) {
    %c0_i32 = arith.constant 0 : i32
    %c0_i32_0 = arith.constant 0 : i32
    return %c0_i32, %arg1 : i32, i32
  }
  func.func @transform_4(%arg0: i32, %arg1: i32, %arg2: i32) -> (i32, i32) {
    %c0_i32 = arith.constant 0 : i32
    %c0_i32_0 = arith.constant 0 : i32
    return %c0_i32, %arg1 : i32, i32
  }
  func.func @transform_5(%arg0: i32, %arg1: i32, %arg2: i32) -> (i32, i32) {
    %c0_i32 = arith.constant 0 : i32
    return %arg0, %arg1 : i32, i32
  }
}

module attributes {stable_mosaic.version = 11 : i64} {
  func.func @_sample_kl_kernel(%arg0: i32, %arg1: i32, %arg2: memref<64x32xf32, #tpu.memory_space<vmem>>, %arg3: memref<64x32xf32, #tpu.memory_space<vmem>>, %arg4: memref<64x32xf32, #tpu.memory_space<vmem>>, %arg5: memref<32x64xbf16, #tpu.memory_space<vmem>>, %arg6: memref<1x1x8x128xf32, #tpu.memory_space<vmem>>) attributes {dimension_semantics = [#tpu.dimension_semantics<parallel>, #tpu.dimension_semantics<parallel>], iteration_bounds = array<i64: 1, 1>, scalar_prefetch = 0 : i64, scratch_operands = 0 : i64, tpu.core_type = #tpu.core_type<tc>, window_params = [{transform_indices = @transform_0, window_bounds = array<i64: 64, 32>}, {transform_indices = @transform_1, window_bounds = array<i64: 64, 32>}, {transform_indices = @transform_2, window_bounds = array<i64: 64, 32>}, {transform_indices = @transform_3, window_bounds = array<i64: 32, 64>}, {transform_indices = @transform_4, window_bounds = array<i64: 1, 1, 8, 128>}]} {
    %c0 = arith.constant 0 : index
    %c0_0 = arith.constant 0 : index
    %0 = vector.load %arg2[%c0, %c0_0] : memref<64x32xf32, #tpu.memory_space<vmem>>, vector<64x32xf32>
    %c0_1 = arith.constant 0 : index
    %c0_2 = arith.constant 0 : index
    %1 = vector.load %arg3[%c0_1, %c0_2] : memref<64x32xf32, #tpu.memory_space<vmem>>, vector<64x32xf32>
    %c0_3 = arith.constant 0 : index
    %c0_4 = arith.constant 0 : index
    %2 = vector.load %arg4[%c0_3, %c0_4] : memref<64x32xf32, #tpu.memory_space<vmem>>, vector<64x32xf32>
    %cst = arith.constant 5.000000e-01 : f32
    %3 = vector.broadcast %cst : f32 to vector<64x32xf32>
    %4 = arith.mulf %3, %1 : vector<64x32xf32>
    %5 = math.exp %4 : vector<64x32xf32>
    %6 = arith.mulf %5, %2 : vector<64x32xf32>
    %7 = arith.addf %0, %6 : vector<64x32xf32>
    %8 = tpu.transpose %7, [1, 0] : vector<64x32xf32> -> vector<32x64xf32>
    %9 = arith.truncf %8 : vector<32x64xf32> to vector<32x64xbf16>
    %c0_5 = arith.constant 0 : index
    %c0_6 = arith.constant 0 : index
    %10 = vector.load %arg5[%c0_5, %c0_6] : memref<32x64xbf16, #tpu.memory_space<vmem>>, vector<32x64xbf16>
    tpu.vector_store %arg5[%c0_5, %c0_6], %9 {strides = array<i32>} : memref<32x64xbf16, #tpu.memory_space<vmem>>, vector<32x64xbf16>,
    %cst_7 = arith.constant 5.000000e-01 : f32
    %11 = vector.broadcast %cst_7 : f32 to vector<64x32xf32>
    %12 = arith.mulf %11, %1 : vector<64x32xf32>
    %cst_8 = arith.constant -0.918938517 : f32
    %13 = vector.broadcast %cst_8 : f32 to vector<64x32xf32>
    %14 = arith.subf %13, %12 : vector<64x32xf32>
    %15 = arith.mulf %2, %2 : vector<64x32xf32>
    %cst_9 = arith.constant 5.000000e-01 : f32
    %16 = vector.broadcast %cst_9 : f32 to vector<64x32xf32>
    %17 = arith.mulf %16, %15 : vector<64x32xf32>
    %18 = arith.subf %14, %17 : vector<64x32xf32>
    %cst_10 = arith.constant 1.000000e+00 : f32
    %19 = vector.broadcast %cst_10 : f32 to vector<64x32xf32>
    %20 = arith.mulf %7, %19 : vector<64x32xf32>
    %21 = arith.mulf %20, %20 : vector<64x32xf32>
    %cst_11 = arith.constant 5.000000e-01 : f32
    %22 = vector.broadcast %cst_11 : f32 to vector<64x32xf32>
    %23 = arith.mulf %22, %21 : vector<64x32xf32>
    %cst_12 = arith.constant -1.6120857 : f32
    %24 = vector.broadcast %cst_12 : f32 to vector<64x32xf32>
    %25 = arith.subf %24, %23 : vector<64x32xf32>
    %cst_13 = arith.constant 403.428802 : f32
    %26 = vector.broadcast %cst_13 : f32 to vector<64x32xf32>
    %27 = arith.mulf %7, %26 : vector<64x32xf32>
    %28 = arith.mulf %27, %27 : vector<64x32xf32>
    %cst_14 = arith.constant 5.000000e-01 : f32
    %29 = vector.broadcast %cst_14 : f32 to vector<64x32xf32>
    %30 = arith.mulf %29, %28 : vector<64x32xf32>
    %cst_15 = arith.constant 4.38791418 : f32
    %31 = vector.broadcast %cst_15 : f32 to vector<64x32xf32>
    %32 = arith.subf %31, %30 : vector<64x32xf32>
    %33 = arith.maximumf %25, %32 : vector<64x32xf32>
    %34 = arith.subf %25, %33 : vector<64x32xf32>
    %35 = math.exp %34 : vector<64x32xf32>
    %36 = arith.subf %32, %33 : vector<64x32xf32>
    %37 = math.exp %36 : vector<64x32xf32>
    %38 = arith.addf %35, %37 : vector<64x32xf32>
    %39 = math.log %38 : vector<64x32xf32>
    %40 = arith.addf %33, %39 : vector<64x32xf32>
    %41 = arith.subf %18, %40 : vector<64x32xf32>
    %42 = vector.shape_cast %41 : vector<64x32xf32> to vector<1x64x32xf32>
    %cst_16 = arith.constant dense<0.000000e+00> : vector<1xf32>
    %43 = vector.multi_reduction <add>, %42, %cst_16 [1, 2] : vector<1x64x32xf32> to vector<1xf32>
    %44 = vector.shape_cast %43 : vector<1xf32> to vector<1x1x1xf32>
    %45 = vector.extract %44[0, 0, 0] : f32 from vector<1x1x1xf32>
    %46 = vector.broadcast %45 : f32 to vector<1x1x8x128xf32>
    %c0_17 = arith.constant 0 : index
    %c0_18 = arith.constant 0 : index
    %c0_19 = arith.constant 0 : index
    %c0_20 = arith.constant 0 : index
    %47 = vector.load %arg6[%c0_17, %c0_18, %c0_19, %c0_20] : memref<1x1x8x128xf32, #tpu.memory_space<vmem>>, vector<1x1x8x128xf32>
    tpu.vector_store %arg6[%c0_17, %c0_18, %c0_19, %c0_20], %46 {strides = array<i32>} : memref<1x1x8x128xf32, #tpu.memory_space<vmem>>, vector<1x1x8x128xf32>,
    return
  }
  func.func @transform_0(%arg0: i32, %arg1: i32) -> (i32, i32) {
    %c0_i32 = arith.constant 0 : i32
    return %arg0, %arg1 : i32, i32
  }
  func.func @transform_1(%arg0: i32, %arg1: i32) -> (i32, i32) {
    %c0_i32 = arith.constant 0 : i32
    return %arg0, %arg1 : i32, i32
  }
  func.func @transform_2(%arg0: i32, %arg1: i32) -> (i32, i32) {
    %c0_i32 = arith.constant 0 : i32
    return %arg0, %arg1 : i32, i32
  }
  func.func @transform_3(%arg0: i32, %arg1: i32) -> (i32, i32) {
    %c0_i32 = arith.constant 0 : i32
    return %arg1, %arg0 : i32, i32
  }
  func.func @transform_4(%arg0: i32, %arg1: i32) -> (i32, i32, i32, i32) {
    %c0_i32 = arith.constant 0 : i32
    %c0_i32_0 = arith.constant 0 : i32
    %c0_i32_1 = arith.constant 0 : i32
    return %arg0, %arg1, %c0_i32, %c0_i32_0 : i32, i32, i32, i32
  }
}

</mosaic_0001>

<bundles_post_ra>
// kernel: bayesian_linear_forward.3
= control target key start
LH: loop header
LB: loop body
LE: loop exit
PB: predicated region body
PF: predicated region fallthrough
CT: control target
= control target key end

     0   :  { %v171_v1 = vmov 0.0   ;;  %vm172_vm0 = vmmov 0   ;;  %vm26_vm1 = vcmask 523264   ;;  %s228_s0 = inlined_call_operand.vmem [shape: f32[8,32], index: 0, kind: input, shape index: {}]   ;;  %s229_s1 = inlined_call_operand.vmem [shape: bf16[32,64], index: 1, kind: input, shape index: {}]   ;;  %s230_s2 = inlined_call_operand.vmem [shape: f32[1,64], index: 2, kind: input, shape index: {}]   ;;  %s231_s3 = inlined_call_operand.vmem [shape: f32[1,64], index: 3, kind: input, shape index: {}]   ;;  %s232_s4 = inlined_call_operand.vmem [shape: f32[1,64], index: 4, kind: input, shape index: {}]   ;;  %s233_s5 = inlined_call_operand.hbm [shape: f32[8,64], index: 5, kind: output, shape index: {}]  }
   0x1   :  { %v145_v0 = vld [vmem:[%s229_s1 + $0x8] sm:$0xff]   ;;  %134 = vmatprep.subr.bf16.mxu0 %v171_v1  ;;  %v146_v2 = vld [vmem:[%s229_s1] sm:$0xff]   ;;  %138 = vmatprep.mubr.msk.bf16.mxu0 %vm172_vm0, %v171_v1 }
   0x2   :  { %135 = vmatpush3.bf16.msra.mxu0 %v145_v0  ;;  %v28_v3 = vld [vmem:[%s228_s0] sm:$0xff] }
   0x3   :  { %10 = vsyncpa [#allocation4], 0  ;;  %136 = vmatprep.subr.bf16.mxu0 %v171_v1  ;;  %27 = vst.msk [vmem:[#allocation2] sm:$0xff] %vm26_vm1, %v171_v1  ;;  %v34_v4 = vpack.c.bf16 %v28_v3, %v28_v3  ;;  %vm47_vm2 = vcmask 261120   ;;  %v98_v5 = vld [vmem:[%s231_s3] sm:$0x1]  ;;  %v107_v8 = vlaneseq }
   0x4   :  { %v99_v6 = vmul.f32 0.5, %v98_v5  ;;  %v102_v10 = vld [vmem:[%s232_s4] sm:$0x1]  ;;  %s173_s3 = smov [#allocation3]  }
   0x5   :  { %v108_v13 = vshrl.u32 %v107_v8, 7  ;;  %v97_v15 = vld [vmem:[%s230_s2] sm:$0x1]  ;;  %s120_s28 = sshll.u32 %s173_s3, 4  ;;  %s121_s28 = int_to_ptr.vmem [resolvable:$true] %s120_s28 }
   0x6   :  { %137 = vmatpush3.bf16.msra.mxu0 %v146_v2  ;;  %v100_v7 = vmul.f32 1.442695, %v99_v6  ;;  %s149_s4 = scalar_lea.vmem %s121_s28, 128  ;;  %p154_p1 = scmp.lt.s32.totalorder %s121_s28, %s121_s28 }
   0x7   :  { %v109_v19 = vsub.s32 0, %v108_v13  ;;  %p150_p0 = scmp.ne.s32.totalorder %s121_s28, %s149_s4  ;;  %p155_p2 = scmp.lt.s32.totalorder %s149_s4, %s149_s4 }
   0x8   :  { %147 = vpow2.f32 %v100_v7 }
   0x9   :  { %139 = vmatmul.mubr.msk.bf16.vlgmr.msra.gmra.mxu0 %vm47_vm2, %v34_v4  ;;  %p156_p3 = por %p155_p2, %p154_p1 }
   0xa   :  { %v33_v11 = vld [vmem:[#allocation2] sm:$0xff] }
   0xb   :  { %p157_p4 = pnand %p156_p3, %p150_p0 }
  0x15   :  { %v148_v9 = vpop.eup %147 }
  0x16   :  { %v103_v12 = vmul.f32 %v148_v9, %v102_v10 }
  0x18   :  { %v104_v18 = vadd.f32 %v103_v12, %v97_v15 }
  0x1a   :  { %v110_v22 = vrot.slane %v104_v18, %v109_v19 }
  0xc9   :  { %v85_v14 = vpop.f32.mrf.mxu0 }
  0xca   :  { %v91_v16 = vadd.f32 %v85_v14, %v33_v11 }
  0xcb   :  { %v140_v17 = vpop.f32.mrf.mxu0 }
  0xcc   :  { %93 = vst.msk [vmem:[#allocation2] sm:$0xff] %vm26_vm1, %v91_v16 }
  0xcd   :  { %v88_v20 = vpop.f32.mrf.mxu0 }
  0xcf   :  { %v141_v21 = vpop.f32.mrf.mxu0 }
  0xd3   :  { %v105_v23 = vld [vmem:[#allocation2] sm:$0xff] }
  0xd4   :  { %v112_v24 = vadd.f32 %v110_v22, %v105_v23 }
  0xd6   :  { %113 = vst.msk [vmem:[#allocation3] sm:$0xff] %vm26_vm1, %v112_v24 }
  0xd7   :  { %160 = shalt.err (!%p157_p4)
}
  0xd8   :  { %123 = dma.vmem_to_hbm [thread:$0]  %s121_s28, 128, %s233_s5, [#allocation4]  }
  0xd9   :  { %169 = dma.done.wait [#allocation4], 128  }
  0xda   :  { %170 = vsyncadd [#allocation4], 4294967168 }
  0xdb   :  { %127 = vsyncpa [#allocation4], 1 }

// kernel: bayesian_linear_forward.2
= control target key start
LH: loop header
LB: loop body
LE: loop exit
PB: predicated region body
PF: predicated region fallthrough
CT: control target
= control target key end

     0   :  { %vm317_vm0 = vcmask 261120   ;;  %vm128_vm1 = vcmask 519168   ;;  %s710_s1 = inlined_call_operand.vmem [shape: f32[64,32], index: 1, kind: input, shape index: {}]   ;;  %s711_s2 = inlined_call_operand.vmem [shape: f32[64,32], index: 2, kind: input, shape index: {}]   ;;  %s712_s0 = inlined_call_operand.vmem [shape: f32[64,32], index: 0, kind: input, shape index: {}]   ;;  %s713_s3 = inlined_call_operand.vmem [shape: bf16[32,64], index: 3, kind: output, shape index: {0}]   ;;  %s714_s4 = inlined_call_operand.vmem [shape: f32[1,1,8,128], index: 4, kind: output, shape index: {1}]  }
   0x1   :  { %v24_v0 = vld [vmem:[%s710_s1] sm:$0xff]  ;;  %v25_v1 = vld [vmem:[%s710_s1 + $0x8] sm:$0xff]  ;;  %v26_v2 = vld [vmem:[%s710_s1 + $0x10] sm:$0xff] }
   0x2   :  { %v27_v3 = vld [vmem:[%s710_s1 + $0x18] sm:$0xff]  ;;  %v464_v4 = vmul.f32 0.5, %v24_v0  ;;  %v28_v5 = vld [vmem:[%s710_s1 + $0x20] sm:$0xff]  ;;  %v29_v6 = vld [vmem:[%s710_s1 + $0x28] sm:$0xff]  ;;  %v475_v8 = vmul.f32 0.5, %v25_v1  ;;  %v477_v9 = vmul.f32 0.5, %v26_v2 }
   0x3   :  { %v30_v7 = vld [vmem:[%s710_s1 + $0x30] sm:$0xff]  ;;  %v479_v10 = vmul.f32 0.5, %v27_v3  ;;  %v31_v11 = vld [vmem:[%s710_s1 + $0x38] sm:$0xff]  ;;  %v484_v12 = vmul.f32 0.5, %v28_v5  ;;  %v486_v13 = vmul.f32 0.5, %v29_v6  ;;  %v503_v24 = vld [vmem:[%s711_s2] sm:$0xff] }
   0x4   :  { %v488_v14 = vmul.f32 0.5, %v30_v7  ;;  %v48_v15 = vmul.f32 1.442695, %v464_v4  ;;  %v491_v16 = vmul.f32 0.5, %v31_v11  ;;  %v50_v17 = vmul.f32 1.442695, %v475_v8 }
   0x5   :  { %v52_v18 = vmul.f32 1.442695, %v477_v9  ;;  %v54_v19 = vmul.f32 1.442695, %v479_v10  ;;  %v56_v20 = vmul.f32 1.442695, %v484_v12 }
   0x6   :  { %363 = vpow2.f32 %v48_v15  ;;  %v58_v21 = vmul.f32 1.442695, %v486_v13  ;;  %v60_v22 = vmul.f32 1.442695, %v488_v14  ;;  %v62_v23 = vmul.f32 1.442695, %v491_v16 }
   0x7   :  { %365 = vpow2.f32 %v50_v17  ;;  %v508_v25 = vld [vmem:[%s711_s2 + $0x8] sm:$0xff]  ;;  %v16_v27 = vld [vmem:[%s712_s0] sm:$0xff]  ;;  %v516_v28 = vld [vmem:[%s711_s2 + $0x10] sm:$0xff] }
   0x8   :  { %367 = vpow2.f32 %v52_v18  ;;  %v17_v30 = vld [vmem:[%s712_s0 + $0x8] sm:$0xff]  ;;  %v524_v31 = vld [vmem:[%s711_s2 + $0x18] sm:$0xff]  ;;  %v18_v34 = vld [vmem:[%s712_s0 + $0x10] sm:$0xff] }
   0x9   :  { %369 = vpow2.f32 %v54_v19  ;;  %v533_v35 = vld [vmem:[%s711_s2 + $0x20] sm:$0xff]  ;;  %v19_v38 = vld [vmem:[%s712_s0 + $0x18] sm:$0xff]  ;;  %v542_v39 = vld [vmem:[%s711_s2 + $0x28] sm:$0xff] }
   0xa   :  { %371 = vpow2.f32 %v56_v20  ;;  %v20_v43 = vld [vmem:[%s712_s0 + $0x20] sm:$0xff]  ;;  %v553_v44 = vld [vmem:[%s711_s2 + $0x30] sm:$0xff]  ;;  %v21_v48 = vld [vmem:[%s712_s0 + $0x28] sm:$0xff] }
   0xb   :  { %373 = vpow2.f32 %v58_v21  ;;  %v564_v49 = vld [vmem:[%s711_s2 + $0x38] sm:$0xff]  ;;  %v22_v55 = vld [vmem:[%s712_s0 + $0x30] sm:$0xff] }
   0xc   :  { %375 = vpow2.f32 %v60_v22  ;;  %v23_v61 = vld [vmem:[%s712_s0 + $0x38] sm:$0xff] }
   0xd   :  { %377 = vpow2.f32 %v62_v23 }
  0x13   :  { %v364_v26 = vpop.eup %363 }
  0x14   :  { %v366_v29 = vpop.eup %365  ;;  %v64_v32 = vmul.f32 %v364_v26, %v503_v24 }
  0x15   :  { %v368_v33 = vpop.eup %367  ;;  %v65_v36 = vmul.f32 %v366_v29, %v508_v25 }
  0x16   :  { %v370_v37 = vpop.eup %369  ;;  %v66_v40 = vmul.f32 %v368_v33, %v516_v28  ;;  %v545_v41 = vadd.f32 %v64_v32, %v16_v27 }
  0x17   :  { %v372_v42 = vpop.eup %371  ;;  %v67_v45 = vmul.f32 %v370_v37, %v524_v31  ;;  %v556_v46 = vadd.f32 %v65_v36, %v17_v30 }
  0x18   :  { %v374_v47 = vpop.eup %373  ;;  %v68_v50 = vmul.f32 %v372_v42, %v533_v35  ;;  %v567_v51 = vadd.f32 %v66_v40, %v18_v34  ;;  %v165_v52 = vmul.f32 %v545_v41, %v545_v41  ;;  %v189_v53 = vmul.f32 403.4288, %v545_v41 }
  0x19   :  { %v376_v54 = vpop.eup %375  ;;  %v69_v56 = vmul.f32 %v374_v47, %v542_v39  ;;  %v576_v57 = vadd.f32 %v67_v45, %v19_v38  ;;  %v166_v58 = vmul.f32 %v556_v46, %v556_v46  ;;  %v190_v59 = vmul.f32 403.4288, %v556_v46 }
  0x1a   :  { %v378_v60 = vpop.eup %377  ;;  %v70_v62 = vmul.f32 %v376_v54, %v553_v44  ;;  %v585_v63 = vadd.f32 %v68_v50, %v20_v43  ;;  %v167_v0 = vmul.f32 %v567_v51, %v567_v51  ;;  %v589_v1 = vmul.f32 0.5, %v165_v52 }
  0x1b   :  { %v71_v2 = vmul.f32 %v378_v60, %v564_v49  ;;  %v592_v3 = vadd.f32 %v69_v56, %v21_v48  ;;  %v168_v5 = vmul.f32 %v576_v57, %v576_v57  ;;  %v174_v6 = vmul.f32 0.5, %v166_v58 }
  0x1c   :  { %v596_v7 = vadd.f32 %v70_v62, %v22_v55  ;;  %v169_v11 = vmul.f32 %v585_v63, %v585_v63  ;;  %v175_v15 = vmul.f32 0.5, %v167_v0  ;;  %v181_v17 = vsub.f32 -1.6120857, %v589_v1 }
  0x1d   :  { %v601_v18 = vadd.f32 %v71_v2, %v23_v61  ;;  %v170_v19 = vmul.f32 %v592_v3, %v592_v3  ;;  %v176_v20 = vmul.f32 0.5, %v168_v5  ;;  %v182_v21 = vsub.f32 -1.6120857, %v174_v6 }
  0x1e   :  { %v171_v22 = vmul.f32 %v596_v7, %v596_v7  ;;  %v177_v23 = vmul.f32 0.5, %v169_v11  ;;  %v183_v26 = vsub.f32 -1.6120857, %v175_v15  ;;  %v191_v27 = vmul.f32 403.4288, %v567_v51 }
  0x1f   :  { %v172_v29 = vmul.f32 %v601_v18, %v601_v18  ;;  %v178_v30 = vmul.f32 0.5, %v170_v19  ;;  %v184_v32 = vsub.f32 -1.6120857, %v176_v20  ;;  %v192_v33 = vmul.f32 403.4288, %v576_v57 }
  0x20   :  { %v179_v34 = vmul.f32 0.5, %v171_v22  ;;  %v185_v36 = vsub.f32 -1.6120857, %v177_v23  ;;  %v193_v37 = vmul.f32 403.4288, %v585_v63  ;;  %v197_v38 = vmul.f32 %v189_v53, %v189_v53 }
  0x21   :  { %v180_v40 = vmul.f32 0.5, %v172_v29  ;;  %v186_v42 = vsub.f32 -1.6120857, %v178_v30  ;;  %v194_v43 = vmul.f32 403.4288, %v592_v3  ;;  %v198_v45 = vmul.f32 %v190_v59, %v190_v59 }
  0x22   :  { %v187_v47 = vsub.f32 -1.6120857, %v179_v34  ;;  %v195_v48 = vmul.f32 403.4288, %v596_v7  ;;  %v196_v50 = vmul.f32 403.4288, %v601_v18  ;;  %v199_v52 = vmul.f32 %v191_v27, %v191_v27 }
  0x23   :  { %v188_v54 = vsub.f32 -1.6120857, %v180_v40  ;;  %v200_v55 = vmul.f32 %v192_v33, %v192_v33  ;;  %v201_v56 = vmul.f32 %v193_v37, %v193_v37  ;;  %v202_v58 = vmul.f32 %v194_v43, %v194_v43 }
  0x24   :  { %v203_v60 = vmul.f32 %v195_v48, %v195_v48  ;;  %v204_v61 = vmul.f32 %v196_v50, %v196_v50  ;;  %v205_v62 = vmul.f32 0.5, %v197_v38  ;;  %v206_v0 = vmul.f32 0.5, %v198_v45 }
  0x25   :  { %v207_v53 = vmul.f32 0.5, %v199_v52  ;;  %v208_v1 = vmul.f32 0.5, %v200_v55  ;;  %v209_v2 = vmul.f32 0.5, %v201_v56  ;;  %v210_v5 = vmul.f32 0.5, %v202_v58 }
  0x26   :  { %v211_v6 = vmul.f32 0.5, %v203_v60  ;;  %v212_v59 = vmul.f32 0.5, %v204_v61  ;;  %v213_v11 = vsub.f32 4.387914, %v205_v62  ;;  %v214_v15 = vsub.f32 4.387914, %v206_v0 }
  0x27   :  { %v215_v19 = vsub.f32 4.387914, %v207_v53  ;;  %v216_v20 = vsub.f32 4.387914, %v208_v1  ;;  %v217_v22 = vsub.f32 4.387914, %v209_v2 }
  0x28   :  { %v218_v23 = vsub.f32 4.387914, %v210_v5  ;;  %v219_v27 = vsub.f32 4.387914, %v211_v6  ;;  %v220_v29 = vsub.f32 4.387914, %v212_v59  ;;  %v615_v30 = vmax.f32 %v181_v17, %v213_v11 }
  0x29   :  { %v617_v33 = vmax.f32 %v182_v21, %v214_v15  ;;  %v619_v34 = vmax.f32 %v183_v26, %v215_v19  ;;  %v621_v37 = vmax.f32 %v184_v32, %v216_v20  ;;  %v623_v38 = vmax.f32 %v185_v36, %v217_v22 }
  0x2a   :  { %v625_v40 = vmax.f32 %v186_v42, %v218_v23  ;;  %v627_v43 = vmax.f32 %v187_v47, %v219_v27  ;;  %v629_v45 = vmax.f32 %v188_v54, %v220_v29  ;;  %v229_v48 = vsub.f32 %v181_v17, %v615_v30 }
  0x2b   :  { %v230_v50 = vsub.f32 %v182_v21, %v617_v33  ;;  %v231_v52 = vsub.f32 %v183_v26, %v619_v34  ;;  %v232_v55 = vsub.f32 %v184_v32, %v621_v37  ;;  %v233_v56 = vsub.f32 %v185_v36, %v623_v38 }
  0x2c   :  { %v234_v58 = vsub.f32 %v186_v42, %v625_v40  ;;  %v235_v60 = vsub.f32 %v187_v47, %v627_v43  ;;  %v237_v61 = vmul.f32 1.442695, %v229_v48  ;;  %v236_v62 = vsub.f32 %v188_v54, %v629_v45 }
  0x2d   :  { %v239_v0 = vmul.f32 1.442695, %v230_v50  ;;  %v241_v53 = vmul.f32 1.442695, %v231_v52  ;;  %v243_v1 = vmul.f32 1.442695, %v232_v55  ;;  %v253_v21 = vsub.f32 %v213_v11, %v615_v30 }
  0x2e   :  { %379 = vpow2.f32 %v237_v61  ;;  %v245_v17 = vmul.f32 1.442695, %v233_v56  ;;  %v247_v26 = vmul.f32 1.442695, %v234_v58  ;;  %v254_v32 = vsub.f32 %v214_v15, %v617_v33 }
  0x2f   :  { %381 = vpow2.f32 %v239_v0  ;;  %v249_v36 = vmul.f32 1.442695, %v235_v60  ;;  %v255_v42 = vsub.f32 %v215_v19, %v619_v34  ;;  %v251_v47 = vmul.f32 1.442695, %v236_v62 }
  0x30   :  { %383 = vpow2.f32 %v241_v53  ;;  %v256_v2 = vsub.f32 %v216_v20, %v621_v37  ;;  %v257_v54 = vsub.f32 %v217_v22, %v623_v38  ;;  %v261_v5 = vmul.f32 1.442695, %v253_v21 }
  0x31   :  { %385 = vpow2.f32 %v243_v1  ;;  %v258_v6 = vsub.f32 %v218_v23, %v625_v40  ;;  %v263_v59 = vmul.f32 1.442695, %v254_v32  ;;  %v259_v11 = vsub.f32 %v219_v27, %v627_v43 }
  0x32   :  { %387 = vpow2.f32 %v245_v17  ;;  %v265_v15 = vmul.f32 1.442695, %v255_v42  ;;  %v260_v48 = vsub.f32 %v220_v29, %v629_v45  ;;  %v267_v19 = vmul.f32 1.442695, %v256_v2 }
  0x33   :  { %389 = vpow2.f32 %v247_v26  ;;  %v269_v50 = vmul.f32 1.442695, %v257_v54  ;;  %v271_v20 = vmul.f32 1.442695, %v258_v6  ;;  %v273_v52 = vmul.f32 1.442695, %v259_v11 }
  0x34   :  { %391 = vpow2.f32 %v249_v36  ;;  %v275_v22 = vmul.f32 1.442695, %v260_v48  ;;  %v141_v11 = vmul.f32 %v503_v24, %v503_v24  ;;  %v143_v48 = vmul.f32 %v516_v28, %v516_v28 }
  0x35   :  { %393 = vpow2.f32 %v251_v47  ;;  %v135_v28 = vsub.f32 -0.9189385, %v477_v9 }
  0x36   :  { %395 = vpow2.f32 %v261_v5  ;;  %v149_v24 = vmul.f32 0.5, %v141_v11 }
  0x37   :  { %397 = vpow2.f32 %v263_v59 }
  0x38   :  { %399 = vpow2.f32 %v265_v15  ;;  %v142_v15 = vmul.f32 %v508_v25, %v508_v25  ;;  %v147_v25 = vmul.f32 %v553_v44, %v553_v44  ;;  %v139_v44 = vsub.f32 -0.9189385, %v488_v14 }
  0x39   :  { %401 = vpow2.f32 %v267_v19  ;;  %v144_v19 = vmul.f32 %v524_v31, %v524_v31  ;;  %v136_v31 = vsub.f32 -0.9189385, %v479_v10  ;;  %v140_v10 = vsub.f32 -0.9189385, %v491_v16 }
  0x3a   :  { %403 = vpow2.f32 %v269_v50  ;;  %v145_v50 = vmul.f32 %v533_v35, %v533_v35  ;;  %v148_v35 = vmul.f32 %v564_v49, %v564_v49 }
  0x3b   :  { %v380_v55 = vpop.eup %379  ;;  %405 = vpow2.f32 %v271_v20  ;;  %v133_v20 = vsub.f32 -0.9189385, %v464_v4 }
  0x3c   :  { %v382_v23 = vpop.eup %381  ;;  %407 = vpow2.f32 %v273_v52  ;;  %v146_v52 = vmul.f32 %v542_v39, %v542_v39  ;;  %v138_v39 = vsub.f32 -0.9189385, %v486_v13 }
  0x3d   :  { %v384_v56 = vpop.eup %383  ;;  %409 = vpow2.f32 %v275_v22  ;;  %v134_v22 = vsub.f32 -0.9189385, %v475_v8  ;;  %v153_v8 = vmul.f32 0.5, %v145_v50 }
  0x3e   :  { %v386_v27 = vpop.eup %385 }
  0x3f   :  { %v388_v58 = vpop.eup %387 }
  0x40   :  { %v390_v60 = vpop.eup %389 }
  0x41   :  { %v392_v29 = vpop.eup %391 }
  0x42   :  { %v394_v61 = vpop.eup %393 }
  0x43   :  { %v396_v62 = vpop.eup %395 }
  0x44   :  { %v398_v0 = vpop.eup %397  ;;  %v277_v53 = vadd.f32 %v396_v62, %v380_v55  ;;  %v150_v55 = vmul.f32 0.5, %v142_v15  ;;  %v155_v62 = vmul.f32 0.5, %v147_v25 }
  0x45   :  { %v400_v1 = vpop.eup %399  ;;  %v278_v17 = vadd.f32 %v398_v0, %v382_v23  ;;  %v151_v23 = vmul.f32 0.5, %v143_v48 }
  0x46   :  { %v402_v21 = vpop.eup %401  ;;  %v279_v26 = vadd.f32 %v400_v1, %v384_v56  ;;  %411 = vlog2.f32 %v277_v53  ;;  %v137_v56 = vsub.f32 -0.9189385, %v484_v12  ;;  %v158_v0 = vsub.f32 %v134_v22, %v150_v55 }
  0x47   :  { %v404_v32 = vpop.eup %403  ;;  %v280_v36 = vadd.f32 %v402_v21, %v386_v27  ;;  %413 = vlog2.f32 %v278_v17  ;;  %v152_v27 = vmul.f32 0.5, %v144_v19  ;;  %v156_v1 = vmul.f32 0.5, %v148_v35 }
  0x48   :  { %v406_v42 = vpop.eup %405  ;;  %v281_v47 = vadd.f32 %v404_v32, %v388_v58  ;;  %415 = vlog2.f32 %v279_v26  ;;  %v159_v17 = vsub.f32 %v135_v28, %v151_v23  ;;  %v161_v32 = vsub.f32 %v137_v56, %v153_v8 }
  0x49   :  { %v408_v2 = vpop.eup %407  ;;  %v282_v54 = vadd.f32 %v406_v42, %v390_v60  ;;  %417 = vlog2.f32 %v280_v36  ;;  %v154_v60 = vmul.f32 0.5, %v146_v52  ;;  %v160_v26 = vsub.f32 %v136_v31, %v152_v27 }
  0x4a   :  { %v410_v5 = vpop.eup %409  ;;  %v283_v6 = vadd.f32 %v408_v2, %v392_v29  ;;  %419 = vlog2.f32 %v281_v47  ;;  %v157_v29 = vsub.f32 %v133_v20, %v149_v24  ;;  %v164_v28 = vsub.f32 %v140_v10, %v156_v1 }
  0x4b   :  { %v284_v59 = vadd.f32 %v410_v5, %v394_v61  ;;  %421 = vlog2.f32 %v282_v54  ;;  %v162_v47 = vsub.f32 %v138_v39, %v154_v60 }
  0x4c   :  { %423 = vlog2.f32 %v283_v6  ;;  %v163_v6 = vsub.f32 %v139_v44, %v155_v62 }
  0x4d   :  { %425 = vlog2.f32 %v284_v59 }
  0x53   :  { %v412_v4 = vpop.eup %411 }
  0x54   :  { %v414_v58 = vpop.eup %413  ;;  %v286_v61 = vmul.f32 0.6931472, %v412_v4 }
  0x55   :  { %v416_v9 = vpop.eup %415  ;;  %v288_v49 = vmul.f32 0.6931472, %v414_v58 }
  0x56   :  { %v418_v53 = vpop.eup %417  ;;  %v290_v12 = vmul.f32 0.6931472, %v416_v9  ;;  %v301_v13 = vadd.f32 %v286_v61, %v615_v30 }
  0x57   :  { %v420_v21 = vpop.eup %419  ;;  %v292_v36 = vmul.f32 0.6931472, %v418_v53  ;;  %v302_v14 = vadd.f32 %v288_v49, %v617_v33 }
  0x58   :  { %v422_v42 = vpop.eup %421  ;;  %v294_v2 = vmul.f32 0.6931472, %v420_v21  ;;  %v303_v16 = vadd.f32 %v290_v12, %v619_v34  ;;  %v309_v54 = vsub.f32 %v157_v29, %v301_v13 }
  0x59   :  { %v424_v5 = vpop.eup %423  ;;  %v296_v59 = vmul.f32 0.6931472, %v422_v42  ;;  %v304_v11 = vadd.f32 %v292_v36, %v621_v37  ;;  %v310_v15 = vsub.f32 %v158_v0, %v302_v14 }
  0x5a   :  { %v426_v48 = vpop.eup %425  ;;  %v298_v30 = vmul.f32 0.6931472, %v424_v5  ;;  %v305_v19 = vadd.f32 %v294_v2, %v623_v38  ;;  %v311_v50 = vsub.f32 %v159_v17, %v303_v16  ;;  %v318_v20 = vsel %vm317_vm0, %v309_v54, 0.0 }
  0x5b   :  { %v300_v33 = vmul.f32 0.6931472, %v426_v48  ;;  %v306_v52 = vadd.f32 %v296_v59, %v625_v40  ;;  %v312_v24 = vsub.f32 %v160_v26, %v304_v11  ;;  %v319_v34 = vsel %vm317_vm0, %v310_v15, 0.0 }
  0x5c   :  { %v307_v22 = vadd.f32 %v298_v30, %v627_v43  ;;  %v313_v25 = vsub.f32 %v161_v32, %v305_v19  ;;  %v320_v55 = vadd.f32 %v319_v34, %v318_v20  ;;  %v321_v37 = vsel %vm317_vm0, %v311_v50, 0.0 }
  0x5d   :  { %v308_v31 = vadd.f32 %v300_v33, %v629_v45  ;;  %v314_v35 = vsub.f32 %v162_v47, %v306_v52  ;;  %v323_v38 = vsel %vm317_vm0, %v312_v24, 0.0 }
  0x5e   :  { %v322_v23 = vadd.f32 %v321_v37, %v320_v55  ;;  %v315_v4 = vsub.f32 %v163_v6, %v307_v22  ;;  %v325_v56 = vsel %vm317_vm0, %v313_v25, 0.0 }
  0x5f   :  { %v316_v39 = vsub.f32 %v164_v28, %v308_v31  ;;  %v327_v27 = vsel %vm317_vm0, %v314_v35, 0.0 }
  0x60   :  { %v324_v40 = vadd.f32 %v323_v38, %v322_v23  ;;  %v329_v43 = vsel %vm317_vm0, %v315_v4, 0.0 }
  0x61   :  { %v331_v44 = vsel %vm317_vm0, %v316_v39, 0.0 }
  0x62   :  { %v326_v8 = vadd.f32 %v325_v56, %v324_v40 }
  0x64   :  { %v328_v58 = vadd.f32 %v327_v27, %v326_v8 }
  0x66   :  { %v330_v60 = vadd.f32 %v329_v43, %v328_v58 }
  0x68   :  { %v332_v29 = vadd.f32 %v331_v44, %v330_v60 }
  0x6a   :  { %333 = vadd.xlane.f32.xlu0 %v332_v29 }
  0x97   :  { %80 = vxpose.xlu0.b32.start [1/8] (short) (narrow) %v545_v41, 32 }
  0x9b   :  { %81 = vxpose.xlu0.b32.cont [2/8] (short) (narrow) %v556_v46, 32 }
  0x9f   :  { %82 = vxpose.xlu0.b32.cont [3/8] (short) (narrow) %v567_v51, 32 }
  0xa3   :  { %83 = vxpose.xlu0.b32.cont [4/8] (short) (narrow) %v576_v57, 32 }
  0xa7   :  { %84 = vxpose.xlu0.b32.cont [5/8] (short) (narrow) %v585_v63, 32 }
  0xab   :  { %85 = vxpose.xlu0.b32.cont [6/8] (short) (narrow) %v592_v3, 32 }
  0xaf   :  { %86 = vxpose.xlu0.b32.cont [7/8] (short) (narrow) %v596_v7, 32 }
  0xb3   :  { %87 = vxpose.xlu0.b32.end [8/8] (short) (narrow) %v601_v18, 32 }
  0xf3   :  { %v334_v45 = vpop.xlane.xlu0 %333 }
  0xf4   :  { %v335_v61 = vrot.slane %v334_v45, 4 }
  0xf6   :  { %v336_v9 = vadd.f32 %v335_v61, %v334_v45 }
  0xf8   :  { %v337_v10 = vrot.slane %v336_v9, 2 }
  0xfa   :  { %v338_v62 = vadd.f32 %v337_v10, %v336_v9 }
  0xfc   :  { %v339_v41 = vrot.slane %v338_v62, 1 }
  0xfe   :  { %v340_v0 = vadd.f32 %v339_v41, %v338_v62 }
 0x100   :  { %360 = vpush %v340_v0 }
 0x113   :  { %v96_v46 = vpop.trf.xlu0 }
 0x114   :  { %v356_v51 = vpack.c.bf16 %v96_v46, %v96_v46 }
 0x116   :  { %129 = vst.msk [vmem:[%s713_s3] sm:$0xf] %vm128_vm1, %v356_v51 }
 0x117   :  { %v97_v57 = vpop.trf.xlu0 }
 0x118   :  { %v357_v63 = vpack.c.bf16 %v97_v57, %v97_v57 }
 0x11a   :  { %130 = vst.msk [vmem:[%s713_s3 + $0x4] sm:$0xf] %vm128_vm1, %v357_v63 }
 0x11b   :  { %v98_v3 = vpop.trf.xlu0 }
 0x11c   :  { %v358_v7 = vpack.c.bf16 %v98_v3, %v98_v3 }
 0x11e   :  { %131 = vst.msk [vmem:[%s713_s3 + $0x8] sm:$0xf] %vm128_vm1, %v358_v7 }
 0x11f   :  { %v99_v18 = vpop.trf.xlu0 }
 0x120   :  { %v359_v49 = vpack.c.bf16 %v99_v18, %v99_v18 }
 0x122   :  { %132 = vst.msk [vmem:[%s713_s3 + $0xc] sm:$0xf] %vm128_vm1, %v359_v49 }
 0x131   :  { %s361_s15 = spop %360 }
 0x132   :  { %v342_v53 = vstv %s361_s15 }
 0x133   :  { %343 = vst [vmem:[%s714_s4] sm:$0xff] %v342_v53 }

</bundles_post_ra>
